<compile_context>
chip_gen: v7x
topology: tpu7x:2x2x1
jax: 0.10.0
libtpu: 0.0.40
codegen_flags: <defaults>
</compile_context>

<pallas_src>
import functools

import jax
import jax.numpy as jnp
from jax.experimental import pallas as pl
from jax.experimental.pallas import tpu as pltpu


def _encoder_kernel(x_ref, wqkv_ref, wcomb_ref, bcomb_ref, o_ref, *, num_heads):
    """One batch element: all-head QKV proj + attention + fused (out_proj ∘ proj)."""
    H = num_heads
    x = x_ref[0]                                           # (S, E)
    S, E = x.shape
    three_h = wqkv_ref.shape[0]                            # 3H

    # All heads' q, k, v in one batched matmul (1/sqrt(hs) already folded into Wq).
    xh = jnp.broadcast_to(x, (three_h, S, E))              # hoisted once, tiny
    qkv = jnp.einsum("hse,hed->hsd", xh, wqkv_ref[...],
                     preferred_element_type=jnp.float32)   # (3H, S, hs)
    q = qkv[:H]                                            # (H, S, hs) leading-dim slices
    k = qkv[H:2 * H]
    v = qkv[2 * H:]

    # Full (non-causal, unmasked) attention; S <= 128 == one flash block.
    s = jnp.einsum("hqd,hkd->hqk", q, k,
                   preferred_element_type=jnp.float32)     # (H, S, S)
    s = s - jnp.max(s, axis=-1, keepdims=True)
    p = jnp.exp(s)
    denom = jnp.sum(p, axis=-1, keepdims=True) + 1e-6      # +1e-6 exactly as in torch code
    p = p * pl.reciprocal(denom, approx=True)              # EUP slot -> effectively free

    attn = jnp.einsum("hqk,hkd->hqd", p, v,
                      preferred_element_type=jnp.float32)  # (H, S, hs)

    # Fused out_proj + final projection: per-head (hs, E) combined weight, summed
    # over heads (mathematically == concat_h(attn_h @ Wout_h^T + bout_h) @ Wproj^T).
    y = jnp.einsum("hqd,hde->hqe", attn, wcomb_ref[...],
                   preferred_element_type=jnp.float32)     # (H, S, E)
    o_ref[0] = jnp.sum(y, axis=0) + bcomb_ref[...]         # (S, E), bias broadcast over S


def prepare_kernel_params(params):
    """One-time host-side repack: stack heads, pre-transpose, fold scale & fuse projections."""
    w_qkv = params["w_qkv"]                                # (H, 3*hs, E), rows [q; k; v]
    w_out = params["w_out"]                                # (H, hs, hs)
    b_out = params["b_out"]                                # (H, 1, hs)
    w_proj = params["w_proj"]                              # (E, H*hs)
    b_proj = params["b_proj"]                              # (1, E)

    H, three_hs, E = w_qkv.shape
    hs = three_hs // 3
    scale = 1.0 / (hs ** 0.5)

    wq_t = jnp.transpose(w_qkv[:, :hs, :], (0, 2, 1)) * scale      # (H, E, hs), scale folded
    wk_t = jnp.transpose(w_qkv[:, hs:2 * hs, :], (0, 2, 1))        # (H, E, hs)
    wv_t = jnp.transpose(w_qkv[:, 2 * hs:, :], (0, 2, 1))          # (H, E, hs)

    wout_t = jnp.transpose(w_out, (0, 2, 1))                       # (H, hs, hs)  == Wout^T
    wproj_t = w_proj.T.reshape(H, hs, E)                           # (H, hs, E)   == Wproj_h^T
    # Fuse: Wcomb_h = Wout_h^T @ Wproj_h^T ; bias folds too (exact algebra).
    wcomb = jnp.einsum("hij,hje->hie", wout_t, wproj_t)            # (H, hs, E)
    bcomb = b_proj + jnp.einsum("hj,hje->e", b_out[:, 0, :], wproj_t)[None, :]   # (1, E)

    return dict(
        wqkv=jnp.concatenate([wq_t, wk_t, wv_t], axis=0),          # (3H, E, hs)
        wcomb=wcomb,                                               # (H, hs, E)
        bcomb=bcomb,                                               # (1, E)
        num_heads=H,
        head_size=hs,
    )


def multi_head_encoder(x, kparams):
    B, S, E = x.shape
    H = kparams["num_heads"]
    hs = kparams["head_size"]
    # flash_attention uses block_size=128; for S <= 128 it is a single block.
    assert S <= 128, "kernel implements the single-flash-block (S <= 128) path"

    wqkv, wcomb, bcomb = kparams["wqkv"], kparams["wcomb"], kparams["bcomb"]

    out = pl.pallas_call(
        functools.partial(_encoder_kernel, num_heads=H),
        out_shape=jax.ShapeDtypeStruct((B, S, E), jnp.float32),
        grid=(B,),
        in_specs=[
            pl.BlockSpec((1, S, E), lambda b: (b, 0, 0)),           # x[b]
            pl.BlockSpec((3 * H, E, hs), lambda b: (0, 0, 0)),      # stacked W_qkv (resident)
            pl.BlockSpec((H, hs, E), lambda b: (0, 0, 0)),          # fused Wout^T @ Wproj^T
            pl.BlockSpec((1, E), lambda b: (0, 0)),                 # fused bias
        ],
        out_specs=pl.BlockSpec((1, S, E), lambda b: (b, 0, 0)),
        compiler_params=pltpu.CompilerParams(
            dimension_semantics=("parallel",),                      # batch axis feeds both TCs
        ),
    )(x, wqkv, wcomb, bcomb)

    # dropout(0.2): identity at inference.
    return out


def init_params(key, embedding_size, head_size, num_heads):
    """Deterministic parameter init (PyTorch Linear-style uniform ranges), torch layout."""
    hs = head_size
    k0, k1, k2, k3, k4 = jax.random.split(key, 5)
    s_qkv = 1.0 / (embedding_size ** 0.5)
    s_out = 1.0 / (hs ** 0.5)
    s_prj = 1.0 / ((num_heads * hs) ** 0.5)
    return dict(
        w_qkv=jax.random.uniform(k0, (num_heads, 3 * hs, embedding_size),
                                 jnp.float32, -s_qkv, s_qkv),
        w_out=jax.random.uniform(k1, (num_heads, hs, hs),
                                 jnp.float32, -s_out, s_out),
        b_out=jax.random.uniform(k2, (num_heads, 1, hs),
                                 jnp.float32, -s_out, s_out),
        w_proj=jax.random.uniform(k3, (embedding_size, num_heads * hs),
                                  jnp.float32, -s_prj, s_prj),
        b_proj=jax.random.uniform(k4, (1, embedding_size),
                                  jnp.float32, -s_prj, s_prj),
    )


def reference(x, params):
    """Pure-JAX reference mirroring the PyTorch forward pass (torch-layout params)."""
    w_qkv, w_out, b_out = params["w_qkv"], params["w_out"], params["b_out"]
    w_proj, b_proj = params["w_proj"], params["b_proj"]
    H, three_hs, _ = w_qkv.shape
    hs = three_hs // 3
    outs = []
    for h in range(H):
        qkv = x @ w_qkv[h].T
        q, k, v = jnp.split(qkv, 3, axis=-1)
        scores = jnp.einsum("bqd,bkd->bqk", q, k) / (hs ** 0.5)
        scores = scores - scores.max(-1, keepdims=True)
        scores = jnp.exp(scores)
        scores = scores / (scores.sum(-1, keepdims=True) + 1e-6)
        attn = jnp.einsum("bqk,bkd->bqd", scores, v)
        outs.append(attn @ w_out[h].T + b_out[h])
    cat = jnp.concatenate(outs, axis=-1)
    return cat @ w_proj.T + b_proj


if __name__ == "__main__":
    # Small shapes consistent with the module: B=2, S=8, embedding_size=32,
    # head_size=16, num_heads=4 (block_size/context_size = 8).
    B, S, E = 2, 8, 32
    head_size, num_heads = 16, 4

    key = jax.random.PRNGKey(0)
    kx, kp = jax.random.split(key)
    x = jax.random.normal(kx, (B, S, E), dtype=jnp.float32)
    params = init_params(kp, E, head_size, num_heads)
    kparams = prepare_kernel_params(params)          # one-time weight repack (host side)

    out = multi_head_encoder(x, kparams)
    out = jax.block_until_ready(out)

    ref = reference(x, params)
    assert out.shape == (B, S, E)
    err = jnp.max(jnp.abs(out - ref))
    assert jnp.allclose(out, ref, rtol=2e-3, atol=2e-3), f"max abs err {err}"
    print("KERNEL_OK")
</pallas_src>

<mosaic_0001>
module attributes {stable_mosaic.version = 11 : i64} {
  func.func @_encoder_kernel(%arg0: i32, %arg1: memref<1x8x32xf32, #tpu.memory_space<vmem>>, %arg2: memref<12x32x16xf32, #tpu.memory_space<vmem>>, %arg3: memref<4x16x32xf32, #tpu.memory_space<vmem>>, %arg4: memref<1x32xf32, #tpu.memory_space<vmem>>, %arg5: memref<1x8x32xf32, #tpu.memory_space<vmem>>) attributes {dimension_semantics = [#tpu.dimension_semantics<parallel>], iteration_bounds = array<i64: 2>, scalar_prefetch = 0 : i64, scratch_operands = 0 : i64, tpu.core_type = #tpu.core_type<tc>, window_params = [{transform_indices = @transform_0, window_bounds = array<i64: 1, 8, 32>}, {pipeline_mode = #tpu.pipeline_mode<synchronous>, transform_indices = @transform_1, window_bounds = array<i64: 12, 32, 16>}, {pipeline_mode = #tpu.pipeline_mode<synchronous>, transform_indices = @transform_2, window_bounds = array<i64: 4, 16, 32>}, {pipeline_mode = #tpu.pipeline_mode<synchronous>, transform_indices = @transform_3, window_bounds = array<i64: 1, 32>}, {transform_indices = @transform_4, window_bounds = array<i64: 1, 8, 32>}]} {
    %c0 = arith.constant 0 : index
    %c0_0 = arith.constant 0 : index
    %c0_1 = arith.constant 0 : index
    %0 = vector.load %arg1[%c0, %c0_0, %c0_1] : memref<1x8x32xf32, #tpu.memory_space<vmem>>, vector<1x8x32xf32>
    %1 = vector.shape_cast %0 : vector<1x8x32xf32> to vector<8x32xf32>
    %2 = vector.shape_cast %1 : vector<8x32xf32> to vector<1x8x32xf32>
    %3 = vector.broadcast %2 : vector<1x8x32xf32> to vector<12x8x32xf32>
    %c0_2 = arith.constant 0 : index
    %c0_3 = arith.constant 0 : index
    %c0_4 = arith.constant 0 : index
    %4 = vector.load %arg2[%c0_2, %c0_3, %c0_4] : memref<12x32x16xf32, #tpu.memory_space<vmem>>, vector<12x32x16xf32>
    "tpu.trace_start"() <{level = 10 : i32, message = "hse,hed->hsd"}> : () -> ()
    %cst = arith.constant dense<0.000000e+00> : vector<12x8x16xf32>
    %5 = tpu.matmul %3, %4, %cst {dimension_numbers = #tpu.dot_dimension_numbers<[2], [1], [1], [2], [0, 0, 0, 1, 1, 2], [0], [0]>} : vector<12x8x32xf32>, vector<12x32x16xf32>, vector<12x8x16xf32> -> vector<12x8x16xf32>
    "tpu.trace_stop"() : () -> ()
    %6 = vector.extract_strided_slice %5 {offsets = [0, 0, 0], sizes = [4, 8, 16], strides = [1, 1, 1]} : vector<12x8x16xf32> to vector<4x8x16xf32>
    %7 = vector.extract_strided_slice %5 {offsets = [4, 0, 0], sizes = [4, 8, 16], strides = [1, 1, 1]} : vector<12x8x16xf32> to vector<4x8x16xf32>
    %8 = vector.extract_strided_slice %5 {offsets = [8, 0, 0], sizes = [4, 8, 16], strides = [1, 1, 1]} : vector<12x8x16xf32> to vector<4x8x16xf32>
    "tpu.trace_start"() <{level = 10 : i32, message = "hqd,hkd->hqk"}> : () -> ()
    %cst_5 = arith.constant dense<0.000000e+00> : vector<4x8x8xf32>
    %9 = tpu.matmul %6, %7, %cst_5 {dimension_numbers = #tpu.dot_dimension_numbers<[2], [2], [1], [1], [0, 0, 0, 1, 1, 1], [0], [0]>} : vector<4x8x16xf32>, vector<4x8x16xf32>, vector<4x8x8xf32> -> vector<4x8x8xf32>
    "tpu.trace_stop"() : () -> ()
    %cst_6 = arith.constant dense<0xFF800000> : vector<4x8xf32>
    %10 = vector.multi_reduction <maximumf>, %9, %cst_6 [2] : vector<4x8x8xf32> to vector<4x8xf32>
    %11 = vector.shape_cast %10 : vector<4x8xf32> to vector<4x8x1xf32>
    %12 = vector.broadcast %11 : vector<4x8x1xf32> to vector<4x8x8xf32>
    %13 = arith.subf %9, %12 : vector<4x8x8xf32>
    %14 = math.exp %13 : vector<4x8x8xf32>
    %cst_7 = arith.constant dense<0.000000e+00> : vector<4x8xf32>
    %15 = vector.multi_reduction <add>, %14, %cst_7 [2] : vector<4x8x8xf32> to vector<4x8xf32>
    %16 = vector.shape_cast %15 : vector<4x8xf32> to vector<4x8x1xf32>
    %cst_8 = arith.constant 9.99999997E-7 : f32
    %17 = vector.broadcast %cst_8 : f32 to vector<4x8x1xf32>
    %18 = arith.addf %16, %17 : vector<4x8x1xf32>
    %19 = tpu.reciprocal %18 {approx = true} : vector<4x8x1xf32> -> vector<4x8x1xf32>
    %20 = vector.broadcast %19 : vector<4x8x1xf32> to vector<4x8x8xf32>
    %21 = arith.mulf %14, %20 : vector<4x8x8xf32>
    "tpu.trace_start"() <{level = 10 : i32, message = "hqk,hkd->hqd"}> : () -> ()
    %cst_9 = arith.constant dense<0.000000e+00> : vector<4x8x16xf32>
    %22 = tpu.matmul %21, %8, %cst_9 {dimension_numbers = #tpu.dot_dimension_numbers<[2], [1], [1], [2], [0, 0, 0, 1, 1, 2], [0], [0]>} : vector<4x8x8xf32>, vector<4x8x16xf32>, vector<4x8x16xf32> -> vector<4x8x16xf32>
    "tpu.trace_stop"() : () -> ()
    %c0_10 = arith.constant 0 : index
    %c0_11 = arith.constant 0 : index
    %c0_12 = arith.constant 0 : index
    %23 = vector.load %arg3[%c0_10, %c0_11, %c0_12] : memref<4x16x32xf32, #tpu.memory_space<vmem>>, vector<4x16x32xf32>
    "tpu.trace_start"() <{level = 10 : i32, message = "hqd,hde->hqe"}> : () -> ()
    %cst_13 = arith.constant dense<0.000000e+00> : vector<4x8x32xf32>
    %24 = tpu.matmul %22, %23, %cst_13 {dimension_numbers = #tpu.dot_dimension_numbers<[2], [1], [1], [2], [0, 0, 0, 1, 1, 2], [0], [0]>} : vector<4x8x16xf32>, vector<4x16x32xf32>, vector<4x8x32xf32> -> vector<4x8x32xf32>
    "tpu.trace_stop"() : () -> ()
    %cst_14 = arith.constant dense<0.000000e+00> : vector<8x32xf32>
    %25 = vector.multi_reduction <add>, %24, %cst_14 [0] : vector<4x8x32xf32> to vector<8x32xf32>
    %c0_15 = arith.constant 0 : index
    %c0_16 = arith.constant 0 : index
    %26 = vector.load %arg4[%c0_15, %c0_16] : memref<1x32xf32, #tpu.memory_space<vmem>>, vector<1x32xf32>
    %27 = vector.broadcast %26 : vector<1x32xf32> to vector<8x32xf32>
    %28 = arith.addf %25, %27 : vector<8x32xf32>
    %c0_17 = arith.constant 0 : index
    %c0_18 = arith.constant 0 : index
    %c0_19 = arith.constant 0 : index
    %29 = vector.load %arg5[%c0_17, %c0_18, %c0_19] : memref<1x8x32xf32, #tpu.memory_space<vmem>>, vector<1x8x32xf32>
    %30 = vector.shape_cast %29 : vector<1x8x32xf32> to vector<8x32xf32>
    %31 = vector.shape_cast %28 : vector<8x32xf32> to vector<1x8x32xf32>
    tpu.vector_store %arg5[%c0_17, %c0_18, %c0_19], %31 {strides = array<i32>} : memref<1x8x32xf32, #tpu.memory_space<vmem>>, vector<1x8x32xf32>,
    return
  }
  func.func @transform_0(%arg0: i32) -> (i32, i32, i32) {
    %c0_i32 = arith.constant 0 : i32
    %c0_i32_0 = arith.constant 0 : i32
    %c0_i32_1 = arith.constant 0 : i32
    return %arg0, %c0_i32, %c0_i32_0 : i32, i32, i32
  }
  func.func @transform_1(%arg0: i32) -> (i32, i32, i32) {
    %c0_i32 = arith.constant 0 : i32
    %c0_i32_0 = arith.constant 0 : i32
    %c0_i32_1 = arith.constant 0 : i32
    %c0_i32_2 = arith.constant 0 : i32
    return %c0_i32, %c0_i32_0, %c0_i32_1 : i32, i32, i32
  }
  func.func @transform_2(%arg0: i32) -> (i32, i32, i32) {
    %c0_i32 = arith.constant 0 : i32
    %c0_i32_0 = arith.constant 0 : i32
    %c0_i32_1 = arith.constant 0 : i32
    %c0_i32_2 = arith.constant 0 : i32
    return %c0_i32, %c0_i32_0, %c0_i32_1 : i32, i32, i32
  }
  func.func @transform_3(%arg0: i32) -> (i32, i32) {
    %c0_i32 = arith.constant 0 : i32
    %c0_i32_0 = arith.constant 0 : i32
    %c0_i32_1 = arith.constant 0 : i32
    return %c0_i32, %c0_i32_0 : i32, i32
  }
  func.func @transform_4(%arg0: i32) -> (i32, i32, i32) {
    %c0_i32 = arith.constant 0 : i32
    %c0_i32_0 = arith.constant 0 : i32
    %c0_i32_1 = arith.constant 0 : i32
    return %arg0, %c0_i32, %c0_i32_0 : i32, i32, i32
  }
}

</mosaic_0001>

<bundles_post_ra>
// kernel: tpu_custom_call.1
= control target key start
LH: loop header
LB: loop body
LE: loop exit
PB: predicated region body
PF: predicated region fallthrough
CT: control target
= control target key end

     0   :  { %9 = vsyncpa [#allocation3], 0  ;;  %s3099_s0 = inlined_call_operand.vmem [shape: f32[2,8,32], index: 0, kind: input, shape index: {}]   ;;  %s3100_s1 = inlined_call_operand.vmem [shape: f32[12,32,16], index: 1, kind: input, shape index: {}]   ;;  %s3101_s2 = inlined_call_operand.vmem [shape: f32[4,16,32], index: 2, kind: input, shape index: {}]   ;;  %s3102_s3 = inlined_call_operand.vmem [shape: f32[1,32], index: 3, kind: input, shape index: {}]   ;;  %s3103_s4 = inlined_call_operand.hbm [shape: f32[2,8,32], index: 4, kind: output, shape index: {}]  }
   0x1   :  { %11 = vsyncpa [#allocation3 + $0x1], 0  ;;  %s2683_s15 = smov 0   ;;  %s2685_s16 = smov 0  }
   0x2   :  { %s2687_s17 = smov 0   ;;  %s2689_s18 = smov 0  }
   0x3 LB: > { %s2704_s19 = sadd.s32 4294967295, %s2652_s18   ;;  %s2121_s20 = sadd.s32 4294967294, %s2652_s18   ;;  %s2652_s18 = sphi %s2689_s18, %s3109_s18   ;;  %s2648_s17 = sphi %s2687_s17, %s3108_s17   ;;  %s2644_s16 = sphi %s2685_s16, %s3107_s16   ;;  %s2640_s15 = sphi %s2683_s15, %s3106_s15  }
   0x4   : > { %s2708_s21 = sadd.s32 1, %s2652_s18   ;;  %s113_s22 = sadd.s32 1, %s2648_s17 }
   0x5   : > { %s110_s23 = ssub.s32 %s2652_s18, %s2708_s21  ;;  %p123_p0 = scmp.ne.s32.totalorder %s2648_s17, %s2644_s16 }
   0x6   : > { %p111_p1 = scmp.eq.s32.totalorder %s110_s23, 0  ;;  %p124_p2 = scmp.eq.s32.totalorder %s2704_s19, 1 }
   0x7   : > { %p129_p3 = scmp.ne.s32.totalorder %s2644_s16, %s2640_s15  ;;  %p130_p4 = scmp.eq.s32.totalorder %s2121_s20, 1 }
   0x8   : > { %s2719_s24 = scalar_select %p111_p1, %s2648_s17, %s113_s22  }
   0x9   : > { %p2721_p5 = por %p124_p2, %p123_p0  ;;  %p2725_p6 = por %p130_p4, %p129_p3 }
   0xa   : > { %p2124_p7 = scmp.ge.s32.totalorder %s2652_s18, 1  ;;  %p164_p8 = scmp.lt.s32.totalorder %s2652_s18, 3 }
   0xc   : > { %p165_p9 = pnand %p2124_p7, %p164_p8 }
   0xd   : > { %v194_v0 = vld [vmem:[%s3100_s1] sm:$0xff] (!%p165_p9)  ;;  %v195_v1 = vld [vmem:[%s3100_s1 + $0x8] sm:$0xff] (!%p165_p9)  ;;  %v2654_v3 = vmov (!%p165_p9), 0.0|0.0   ;;  %v196_v6 = vld [vmem:[%s3100_s1 + $0x10] sm:$0xff] (!%p165_p9)  ;;  %p189_p10 = scmp.lt.s32.totalorder (!%p165_p9), %s2704_s19, 1  ;;  %vm2655_vm0 = vmmov (!%p165_p9), 0  }
   0xe   : > { %168 = sbr.rel (%p165_p9) target bundleno = 1240 (0x4d8), region = 36  ;;  %v198_v2 = vld [vmem:[%s3100_s1 + $0x20] sm:$0xff] (!%p165_p9)  ;;  %2448 = vmatprep.subr.bf16.mxu0 (!%p165_p9), %v2654_v3  ;;  %2454 = vmatprep.subr.bf16.mxu1 (!%p165_p9), %v2654_v3  ;;  %v2449_v4 = vpack.c.bf16 (!%p165_p9), %v195_v1, %v194_v0  ;;  %v199_v5 = vld [vmem:[%s3100_s1 + $0x28] sm:$0xff] (!%p165_p9)  ;;  %v197_v7 = vld [vmem:[%s3100_s1 + $0x18] sm:$0xff] (!%p165_p9)  ;;  %v2656_v11 = vmov (!%p165_p9), 0.0   ;;  %vm242_vm1 = vcmask (!%p165_p9), 261120  }
   0xf   : > { %v2455_v8 = vpack.c.bf16 (!%p165_p9), %v199_v5, %v198_v2  ;;  %v200_v9 = vld [vmem:[%s3100_s1 + $0x30] sm:$0xff] (!%p165_p9)  ;;  %v201_v10 = vld [vmem:[%s3100_s1 + $0x38] sm:$0xff] (!%p165_p9)  ;;  %2256 = vmatprep.mubr.msk.f32.mxu0 (!%p165_p9), %vm2655_vm0, %v2656_v11  ;;  %2267 = vmatprep.mubr.msk.f32.mxu1 (!%p165_p9), %vm2655_vm0, %v2656_v11  ;;  %v2452_v12 = vpack.c.bf16 (!%p165_p9), %v197_v7, %v196_v6  ;;  %v202_v14 = vld [vmem:[%s3100_s1 + $0x40] sm:$0xff] (!%p165_p9)  ;;  %vm1086_vm2 = vcmask (!%p165_p9), 130048   ;;  %vm1391_vm3 = vcmask (!%p165_p9), 64512   ;;  %s186_s22 = sand.u32 (!%p165_p9), 1, %s2644_s16  }
  0x10   : > { %2450 = vmatpush3.bf16.msra.mxu0 (!%p165_p9), %v2449_v4  ;;  %v2458_v13 = vpack.c.bf16 (!%p165_p9), %v201_v10, %v200_v9  ;;  %v203_v15 = vld [vmem:[%s3100_s1 + $0x48] sm:$0xff] (!%p165_p9)  ;;  %v206_v16 = vld [vmem:[%s3100_s1 + $0x60] sm:$0xff] (!%p165_p9)  ;;  %v204_v21 = vld [vmem:[%s3100_s1 + $0x50] sm:$0xff] (!%p165_p9)  ;;  %s2157_s29 = sshll.u32 (!%p165_p9), %s2704_s19, 7  ;;  %s2049_s9 = scalar_lea.sflag (!%p165_p9), [#allocation3], %s186_s22 }
  0x11   : > { %2456 = vmatpush3.bf16.msra.mxu1 (!%p165_p9), %v2455_v8  ;;  %2451 = vmatprep.subr.bf16.mxu0 (!%p165_p9), %v2654_v3  ;;  %v207_v17 = vld [vmem:[%s3100_s1 + $0x68] sm:$0xff] (!%p165_p9)  ;;  %v2461_v19 = vpack.c.bf16 (!%p165_p9), %v203_v15, %v202_v14  ;;  %v205_v22 = vld [vmem:[%s3100_s1 + $0x58] sm:$0xff] (!%p165_p9)  ;;  %v208_v23 = vld [vmem:[%s3100_s1 + $0x70] sm:$0xff] (!%p165_p9)  ;;  %s3056_s8 = scalar_lea.hbm (!%p165_p9), %s3103_s4, %s2157_s29 }
  0x12   : > { %2457 = vmatprep.subr.bf16.mxu1 (!%p165_p9), %v2654_v3  ;;  %v2467_v20 = vpack.c.bf16 (!%p165_p9), %v207_v17, %v206_v16  ;;  %v209_v24 = vld [vmem:[%s3100_s1 + $0x78] sm:$0xff] (!%p165_p9)  ;;  %v2464_v25 = vpack.c.bf16 (!%p165_p9), %v205_v22, %v204_v21  ;;  %v210_v27 = vld [vmem:[%s3100_s1 + $0x80] sm:$0xff] (!%p165_p9)  ;;  %v211_v28 = vld [vmem:[%s3100_s1 + $0x88] sm:$0xff] (!%p165_p9) }
  0x13   : > { %v2470_v26 = vpack.c.bf16 (!%p165_p9), %v209_v24, %v208_v23  ;;  %v214_v29 = vld [vmem:[%s3100_s1 + $0xa0] sm:$0xff] (!%p165_p9)  ;;  %v215_v30 = vld [vmem:[%s3100_s1 + $0xa8] sm:$0xff] (!%p165_p9)  ;;  %v2473_v31 = vpack.c.bf16 (!%p165_p9), %v211_v28, %v210_v27  ;;  %v212_v33 = vld [vmem:[%s3100_s1 + $0x90] sm:$0xff] (!%p165_p9) }
  0x14   : > { %2453 = vmatpush3.bf16.msra.mxu0 (!%p165_p9), %v2452_v12  ;;  %v2479_v32 = vpack.c.bf16 (!%p165_p9), %v215_v30, %v214_v29  ;;  %v213_v34 = vld [vmem:[%s3100_s1 + $0x98] sm:$0xff] (!%p165_p9)  ;;  %v216_v35 = vld [vmem:[%s3100_s1 + $0xb0] sm:$0xff] (!%p165_p9)  ;;  %v218_v39 = vld [vmem:[%s3100_s1 + $0xc0] sm:$0xff] (!%p165_p9) }
  0x15   : > { %s190_s23 = scalar_select %p189_p10, %s2704_s19, 1  ;;  %2459 = vmatpush3.bf16.msra.mxu1 %v2458_v13  ;;  %2460 = vmatprep.subr.bf16.mxu0 %v2654_v3  ;;  %v217_v36 = vld [vmem:[%s3100_s1 + $0xb8] sm:$0xff]  ;;  %v2476_v37 = vpack.c.bf16 %v213_v34, %v212_v33  ;;  %v219_v40 = vld [vmem:[%s3100_s1 + $0xc8] sm:$0xff]  ;;  %v222_v41 = vld [vmem:[%s3100_s1 + $0xe0] sm:$0xff] }
  0x16   : > { %2466 = vmatprep.subr.bf16.mxu1 %v2654_v3  ;;  %v2482_v38 = vpack.c.bf16 %v217_v36, %v216_v35  ;;  %v223_v42 = vld [vmem:[%s3100_s1 + $0xe8] sm:$0xff]  ;;  %v2485_v43 = vpack.c.bf16 %v219_v40, %v218_v39  ;;  %v220_v45 = vld [vmem:[%s3100_s1 + $0xd0] sm:$0xff]  ;;  %v221_v46 = vld [vmem:[%s3100_s1 + $0xd8] sm:$0xff]  ;;  %s2657_s19 = smov [#allocation2]  }
  0x17   : > { %s2126_s5 = sshll.u32 %s190_s23, 3  ;;  %v2491_v44 = vpack.c.bf16 %v223_v42, %v222_v41  ;;  %v224_v47 = vld [vmem:[%s3100_s1 + $0xf0] sm:$0xff]  ;;  %v225_v48 = vld [vmem:[%s3100_s1 + $0xf8] sm:$0xff]  ;;  %v2488_v49 = vpack.c.bf16 %v221_v46, %v220_v45  ;;  %v226_v51 = vld [vmem:[%s3100_s1 + $0x100] sm:$0xff]  ;;  %s2125_s23 = sshll.u32 %s186_s22, 3 }
  0x18   : > { %s192_s12 = scalar_lea.vmem %s3099_s0, %s2126_s5  ;;  %v2494_v50 = vpack.c.bf16 %v225_v48, %v224_v47  ;;  %v227_v52 = vld [vmem:[%s3100_s1 + $0x108] sm:$0xff]  ;;  %v230_v53 = vld [vmem:[%s3100_s1 + $0x120] sm:$0xff]  ;;  %v228_v57 = vld [vmem:[%s3100_s1 + $0x110] sm:$0xff]  ;;  %s188_s30 = scalar_lea.vmem [#allocation2], %s2125_s23 }
  0x19   : > { %v2780_v18 = vld [vmem:[%s192_s12] sm:$0xff]  ;;  %v231_v54 = vld [vmem:[%s3100_s1 + $0x128] sm:$0xff]  ;;  %v2497_v55 = vpack.c.bf16 %v227_v52, %v226_v51  ;;  %v229_v58 = vld [vmem:[%s3100_s1 + $0x118] sm:$0xff]  ;;  %s2062_s5 = sshll.u32 %s188_s30, 4  ;;  %s2594_s11 = sshll.u32 %s2657_s19, 4  ;;  %s3058_s5 = int_to_ptr.vmem [resolvable:$true] %s2062_s5  ;;  %s2595_s11 = int_to_ptr.vmem [resolvable:$false] %s2594_s11 }
  0x1a   : > { %2257 = vmatmul.mubr.msk.f32.vlgmr.msra.gmra.mrb[0].mxu0 %vm242_vm1, %v2780_v18  ;;  %2268 = vmatmul.mubr.msk.f32.vlgmr.msra.gmra.mrb[0].mxu1 %vm242_vm1, %v2780_v18  ;;  %v2503_v56 = vpack.c.bf16 %v231_v54, %v230_v53  ;;  %v232_v59 = vld [vmem:[%s3100_s1 + $0x130] sm:$0xff]  ;;  %v2500_v60 = vpack.c.bf16 %v229_v58, %v228_v57  ;;  %v233_v61 = vld [vmem:[%s3100_s1 + $0x138] sm:$0xff]  ;;  %v234_v63 = vld [vmem:[%s3100_s1 + $0x140] sm:$0xff]  ;;  %s2590_s10 = scalar_lea.vmem %s3058_s5, 128  ;;  %s2596_s12 = scalar_lea.vmem %s2595_s11, 256 }
  0x1b   : > { %2462 = vmatpush3.bf16.msra.mxu0 %v2461_v19  ;;  %2468 = vmatpush3.bf16.msra.mxu1 %v2467_v20  ;;  %v2506_v62 = vpack.c.bf16 %v233_v61, %v232_v59  ;;  %v235_v0 = vld [vmem:[%s3100_s1 + $0x148] sm:$0xff]  ;;  %v238_v1 = vld [vmem:[%s3100_s1 + $0x160] sm:$0xff]  ;;  %v236_v6 = vld [vmem:[%s3100_s1 + $0x150] sm:$0xff]  ;;  %p2591_p11 = scmp.ne.s32.totalorder %s3058_s5, %s2590_s10  ;;  %p2597_p0 = scmp.lt.s32.totalorder %s3058_s5, %s2595_s11 }
  0x1c   : > { %2463 = vmatprep.subr.bf16.mxu0 %v2654_v3  ;;  %2469 = vmatprep.subr.bf16.mxu1 %v2654_v3  ;;  %v2509_v2 = vpack.c.bf16 %v235_v0, %v234_v63  ;;  %v239_v4 = vld [vmem:[%s3100_s1 + $0x168] sm:$0xff]  ;;  %v237_v7 = vld [vmem:[%s3100_s1 + $0x158] sm:$0xff]  ;;  %v240_v8 = vld [vmem:[%s3100_s1 + $0x170] sm:$0xff]  ;;  %p2598_p1 = scmp.lt.s32.totalorder %s2596_s12, %s2590_s10 }
  0x1d   : > { %2278 = vmatprep.mubr.msk.f32.mxu0 %vm2655_vm0, %v2656_v11  ;;  %2289 = vmatprep.mubr.msk.f32.mxu1 %vm2655_vm0, %v2656_v11  ;;  %v2515_v5 = vpack.c.bf16 %v239_v4, %v238_v1  ;;  %v2512_v9 = vpack.c.bf16 %v237_v7, %v236_v6  ;;  %v241_v10 = vld [vmem:[%s3100_s1 + $0x178] sm:$0xff]  ;;  %p2592_p12 = pnand %p2591_p11, %p2721_p5 }
  0x1e   : > { %v2518_v12 = vpack.c.bf16 %v241_v10, %v240_v8  ;;  %p2599_p2 = por %p2598_p1, %p2597_p0 }
  0x1f   : > { %2465 = vmatpush3.bf16.msra.mxu0 %v2464_v25  ;;  %2471 = vmatpush3.bf16.msra.mxu1 %v2470_v26  ;;  %p2593_p13 = pneg %p2592_p12 }
  0x20   : > { %2472 = vmatprep.subr.bf16.mxu0 %v2654_v3  ;;  %2478 = vmatprep.subr.bf16.mxu1 %v2654_v3 }
  0x21   : > { %p2600_p3 = pnand %p2599_p2, %p2593_p13 }
  0x22   : > { %2279 = vmatmul.mubr.msk.f32.vlgmr.msra.gmra.mrb[2].mxu0 %vm242_vm1, %v2780_v18  ;;  %2290 = vmatmul.mubr.msk.f32.vlgmr.msra.gmra.mrb[2].mxu1 %vm242_vm1, %v2780_v18 }
  0x23   : > { %2474 = vmatpush3.bf16.msra.mxu0 %v2473_v31  ;;  %2480 = vmatpush3.bf16.msra.mxu1 %v2479_v32 }
  0x24   : > { %2475 = vmatprep.subr.bf16.mxu0 %v2654_v3  ;;  %2481 = vmatprep.subr.bf16.mxu1 %v2654_v3 }
  0x25   : > { %2300 = vmatprep.mubr.msk.f32.mxu0 %vm2655_vm0, %v2656_v11  ;;  %2311 = vmatprep.mubr.msk.f32.mxu1 %vm2655_vm0, %v2656_v11 }
  0x27   : > { %2477 = vmatpush3.bf16.msra.mxu0 %v2476_v37  ;;  %2483 = vmatpush3.bf16.msra.mxu1 %v2482_v38 }
  0x28   : > { %2484 = vmatprep.subr.bf16.mxu0 %v2654_v3  ;;  %2490 = vmatprep.subr.bf16.mxu1 %v2654_v3 }
  0x2a   : > { %2301 = vmatmul.mubr.msk.f32.vlgmr.msra.gmra.mrb[4].mxu0 %vm242_vm1, %v2780_v18  ;;  %2312 = vmatmul.mubr.msk.f32.vlgmr.msra.gmra.mrb[4].mxu1 %vm242_vm1, %v2780_v18 }
  0x2b   : > { %2486 = vmatpush3.bf16.msra.mxu0 %v2485_v43  ;;  %2492 = vmatpush3.bf16.msra.mxu1 %v2491_v44 }
  0x2c   : > { %2487 = vmatprep.subr.bf16.mxu0 %v2654_v3  ;;  %2493 = vmatprep.subr.bf16.mxu1 %v2654_v3 }
  0x2d   : > { %2322 = vmatprep.mubr.msk.f32.mxu0 %vm2655_vm0, %v2656_v11  ;;  %2333 = vmatprep.mubr.msk.f32.mxu1 %vm2655_vm0, %v2656_v11 }
  0x2f   : > { %2489 = vmatpush3.bf16.msra.mxu0 %v2488_v49  ;;  %2495 = vmatpush3.bf16.msra.mxu1 %v2494_v50 }
  0x30   : > { %2496 = vmatprep.subr.bf16.mxu0 %v2654_v3  ;;  %2502 = vmatprep.subr.bf16.mxu1 %v2654_v3 }
  0x32   : > { %2323 = vmatmul.mubr.msk.f32.vlgmr.msra.gmra.mrb[6].mxu0 %vm242_vm1, %v2780_v18  ;;  %2334 = vmatmul.mubr.msk.f32.vlgmr.msra.gmra.mrb[6].mxu1 %vm242_vm1, %v2780_v18 }
  0x33   : > { %2498 = vmatpush3.bf16.msra.mxu0 %v2497_v55  ;;  %2504 = vmatpush3.bf16.msra.mxu1 %v2503_v56 }
  0x34   : > { %2499 = vmatprep.subr.bf16.mxu0 %v2654_v3  ;;  %2505 = vmatprep.subr.bf16.mxu1 %v2654_v3 }
  0x35   : > { %2344 = vmatprep.mubr.msk.f32.mxu0 %vm2655_vm0, %v2656_v11  ;;  %2355 = vmatprep.mubr.msk.f32.mxu1 %vm2655_vm0, %v2656_v11 }
  0x37   : > { %2501 = vmatpush3.bf16.msra.mxu0 %v2500_v60  ;;  %2507 = vmatpush3.bf16.msra.mxu1 %v2506_v62 }
  0x38   : > { %2508 = vmatprep.subr.bf16.mxu0 %v2654_v3  ;;  %2514 = vmatprep.subr.bf16.mxu1 %v2654_v3 }
  0x3a   : > { %2345 = vmatmul.mubr.msk.f32.vlgmr.msra.gmra.mrb[8].mxu0 %vm242_vm1, %v2780_v18  ;;  %2356 = vmatmul.mubr.msk.f32.vlgmr.msra.gmra.mrb[8].mxu1 %vm242_vm1, %v2780_v18 }
  0x3b   : > { %2510 = vmatpush3.bf16.msra.mxu0 %v2509_v2  ;;  %2516 = vmatpush3.bf16.msra.mxu1 %v2515_v5 }
  0x3c   : > { %2511 = vmatprep.subr.bf16.mxu0 %v2654_v3  ;;  %2517 = vmatprep.subr.bf16.mxu1 %v2654_v3 }
  0x3d   : > { %2366 = vmatprep.mubr.msk.f32.mxu0 %vm2655_vm0, %v2656_v11  ;;  %2377 = vmatprep.mubr.msk.f32.mxu1 %vm2655_vm0, %v2656_v11 }
  0x3f   : > { %2513 = vmatpush3.bf16.msra.mxu0 %v2512_v9  ;;  %2519 = vmatpush3.bf16.msra.mxu1 %v2518_v12 }
  0x40   : > { %2380 = vmatprep.subr.mxu0 %v2656_v11  ;;  %2385 = vmatprep.subr.mxu1 %v2656_v11 }
  0x42   : > { %2367 = vmatmul.mubr.msk.f32.vlgmr.msra.gmra.mrb[10].mxu0 %vm242_vm1, %v2780_v18  ;;  %2378 = vmatmul.mubr.msk.f32.vlgmr.msra.gmra.mrb[10].mxu1 %vm242_vm1, %v2780_v18 }
  0x43   : > { %2382 = vmatprep.mubr.msk.f32.mxu0 %vm2655_vm0, %v2656_v11  ;;  %2387 = vmatprep.mubr.msk.f32.mxu1 %vm2655_vm0, %v2656_v11 }
  0xed   : > { %v312_v13 = vpop.f32.mrb[0].mxu0  ;;  %v382_v15 = vpop.f32.mrb[0].mxu1 }
  0xee   : > { %v2258_v14 = vpop.f32.mrb[1].mxu0  ;;  %v2269_v16 = vpop.f32.mrb[1].mxu1 }
  0xf5   : > { %v452_v17 = vpop.f32.mrb[2].mxu0  ;;  %v522_v20 = vpop.f32.mrb[2].mxu1 }
  0xf6   : > { %v2280_v19 = vpop.f32.mrb[3].mxu0  ;;  %v2291_v21 = vpop.f32.mrb[3].mxu1 }
  0xf7   : > { %v1733_v21 = vld [vmem:[%s3101_s2 + $0x8] sm:$0xff] }
  0xfd   : > { %v592_v22 = vpop.f32.mrb[4].mxu0  ;;  %v662_v23 = vpop.f32.mrb[4].mxu1 }
  0xfe   : > { %v2302_v24 = vpop.f32.mrb[5].mxu0  ;;  %2381 = vmatpush3.xpose.msk.msra.mxu0 %vm1086_vm2, %v592_v22  ;;  %2386 = vmatpush3.xpose.msk.msra.mxu1 %vm1086_vm2, %v662_v23  ;;  %v2313_v18 = vpop.f32.mrb[5].mxu1 }
  0xff   : > { %2390 = vmatprep.subr.mxu0 %v2656_v11  ;;  %2395 = vmatprep.subr.mxu1 %v2656_v11 }
 0x101   : > { %2383 = vmatmul.mubr.msk.f32.vlgmr.msra.gmra.mrb[12].mxu0 %vm1086_vm2, %v312_v13  ;;  %2388 = vmatmul.mubr.msk.f32.vlgmr.msra.gmra.mrb[12].mxu1 %vm1086_vm2, %v382_v15 }
 0x102   : > { %2392 = vmatprep.mubr.msk.f32.mxu0 %vm2655_vm0, %v2656_v11  ;;  %2397 = vmatprep.mubr.msk.f32.mxu1 %vm2655_vm0, %v2656_v11 }
 0x105   : > { %v732_v25 = vpop.f32.mrb[6].mxu0  ;;  %v802_v26 = vpop.f32.mrb[6].mxu1 }
 0x106   : > { %v2324_v27 = vpop.f32.mrb[7].mxu0  ;;  %2391 = vmatpush3.xpose.msk.msra.mxu0 %vm1086_vm2, %v732_v25  ;;  %2396 = vmatpush3.xpose.msk.msra.mxu1 %vm1086_vm2, %v802_v26  ;;  %v2335_v28 = vpop.f32.mrb[7].mxu1  ;;  %v1734_v26 = vld [vmem:[%s3101_s2 + $0x10] sm:$0xff] }
 0x107   : > { %2400 = vmatprep.subr.mxu0 %v2656_v11  ;;  %2405 = vmatprep.subr.mxu1 %v2656_v11  ;;  %v1735_v27 = vld [vmem:[%s3101_s2 + $0x18] sm:$0xff] }
 0x108   : > { %v2524_v28 = vpack.c.bf16 %v1735_v27, %v1734_v26 }
 0x109   : > { %2393 = vmatmul.mubr.msk.f32.vlgmr.msra.gmra.mrb[14].mxu0 %vm1086_vm2, %v452_v17  ;;  %2398 = vmatmul.mubr.msk.f32.vlgmr.msra.gmra.mrb[14].mxu1 %vm1086_vm2, %v522_v20  ;;  %v1732_v20 = vld [vmem:[%s3101_s2] sm:$0xff] }
 0x10a   : > { %2402 = vmatprep.mubr.msk.f32.mxu0 %vm2655_vm0, %v2656_v11  ;;  %2407 = vmatprep.mubr.msk.f32.mxu1 %vm2655_vm0, %v2656_v11  ;;  %v2521_v23 = vpack.c.bf16 %v1733_v21, %v1732_v20 }
 0x10d   : > { %v872_v29 = vpop.f32.mrb[8].mxu0  ;;  %v942_v31 = vpop.f32.mrb[8].mxu1 }
 0x10e   : > { %v2346_v30 = vpop.f32.mrb[9].mxu0  ;;  %2401 = vmatpush3.msra.mxu0 %v872_v29  ;;  %v2357_v32 = vpop.f32.mrb[9].mxu1  ;;  %2406 = vmatpush3.msra.mxu1 %v942_v31  ;;  %v1736_v29 = vld [vmem:[%s3101_s2 + $0x20] sm:$0xff] }
 0x10f   : > { %2410 = vmatprep.subr.mxu0 %v2656_v11  ;;  %2415 = vmatprep.subr.mxu1 %v2656_v11  ;;  %v1737_v30 = vld [vmem:[%s3101_s2 + $0x28] sm:$0xff]  ;;  %v1738_v32 = vld [vmem:[%s3101_s2 + $0x30] sm:$0xff] }
 0x110   : > { %v2527_v31 = vpack.c.bf16 %v1737_v30, %v1736_v29 }
 0x115   : > { %v2982_v33 = vpop.f32.mrb[10].mxu0  ;;  %v2984_v34 = vpop.f32.mrb[10].mxu1 }
 0x116   : > { %v2368_v35 = vpop.f32.mrb[11].mxu0  ;;  %v2379_v36 = vpop.f32.mrb[11].mxu1 }
 0x1d4   : > { %v1159_v37 = vpop.f32.mrb[12].mxu0  ;;  %v1235_v38 = vpop.f32.mrb[12].mxu1 }
 0x1d5   : > { %v2384_v39 = vpop.f32.mrb[13].mxu0  ;;  %v1392_v40 = vsel %vm1391_vm3, %v1159_v37, -inf  ;;  %v2389_v41 = vpop.f32.mrb[13].mxu1  ;;  %v1395_v42 = vsel %vm1391_vm3, %v1235_v38, -inf }
 0x1d6   : > { %1393 = vmax.xlane.f32.xlu0 %v1392_v40 }
 0x1da   : > { %1396 = vmax.xlane.f32.xlu0 %v1395_v42 }
 0x1dc   : > { %v1311_v43 = vpop.f32.mrb[14].mxu0  ;;  %v1387_v44 = vpop.f32.mrb[14].mxu1 }
 0x1dd   : > { %v2394_v45 = vpop.f32.mrb[15].mxu0  ;;  %v1398_v46 = vsel %vm1391_vm3, %v1311_v43, -inf  ;;  %v2399_v47 = vpop.f32.mrb[15].mxu1  ;;  %v1401_v48 = vsel %vm1391_vm3, %v1387_v44, -inf }
 0x1de   : > { %1399 = vmax.xlane.f32.xlu1 %v1398_v46 }
 0x1e2   : > { %1402 = vmax.xlane.f32.xlu1 %v1401_v48 }
 0x263   : > { %v1394_v49 = vpop.xlane.xlu0 %1393 }
 0x264   : > { %v1404_v50 = vsub.f32 %v1159_v37, %v1394_v49 }
 0x266   : > { %v1408_v51 = vmul.f32 1.442695, %v1404_v50 }
 0x267   : > { %v1397_v52 = vpop.xlane.xlu0 %1396 }
 0x268   : > { %2574 = vpow2.f32 %v1408_v51  ;;  %v1405_v53 = vsub.f32 %v1235_v38, %v1397_v52 }
 0x26a   : > { %v1410_v54 = vmul.f32 1.442695, %v1405_v53 }
 0x26b   : > { %v1400_v55 = vpop.xlane.xlu1 %1399 }
 0x26c   : > { %2576 = vpow2.f32 %v1410_v54  ;;  %v1406_v56 = vsub.f32 %v1311_v43, %v1400_v55  ;;  %v2155_v54 = vld [vmem:[%s3102_s3] ss:$0 sm:$0xff] }
 0x26e   : > { %v1412_v57 = vmul.f32 1.442695, %v1406_v56 }
 0x26f   : > { %v1403_v58 = vpop.xlane.xlu1 %1402 }
 0x270   : > { %2578 = vpow2.f32 %v1412_v57  ;;  %v1407_v59 = vsub.f32 %v1387_v44, %v1403_v58 }
 0x272   : > { %v2575_v60 = vpop.eup %2574  ;;  %v1414_v61 = vmul.f32 1.442695, %v1407_v59 }
 0x273   : > { %v1416_v62 = vsel %vm1391_vm3, %v2575_v60, 0.0 }
 0x274   : > { %2580 = vpow2.f32 %v1414_v61  ;;  %1417 = vadd.xlane.f32.xlu0 %v1416_v62 }
 0x276   : > { %v2577_v63 = vpop.eup %2576 }
 0x277   : > { %v1419_v0 = vsel %vm1391_vm3, %v2577_v63, 0.0 }
 0x278   : > { %1420 = vadd.xlane.f32.xlu1 %v1419_v0 }
 0x27a   : > { %v2579_v1 = vpop.eup %2578 }
 0x27b   : > { %v1422_v2 = vsel %vm1391_vm3, %v2579_v1, 0.0 }
 0x27c   : > { %1423 = vadd.xlane.f32.xlu0 %v1422_v2 }
 0x27e   : > { %v2581_v4 = vpop.eup %2580 }
 0x27f   : > { %v1425_v5 = vsel %vm1391_vm3, %v2581_v4, 0.0 }
 0x280   : > { %1426 = vadd.xlane.f32.xlu1 %v1425_v5 }
 0x301   : > { %v1418_v6 = vpop.xlane.xlu0 %1417 }
 0x302   : > { %v1428_v7 = vadd.f32 1e-06, %v1418_v6 }
 0x304   : > { %2582 = vrcp.f32 %v1428_v7 }
 0x305   : > { %v1421_v8 = vpop.xlane.xlu1 %1420 }
 0x306   : > { %v1429_v9 = vadd.f32 1e-06, %v1421_v8 }
 0x308   : > { %2584 = vrcp.f32 %v1429_v9 }
 0x309   : > { %v1424_v10 = vpop.xlane.xlu0 %1423 }
 0x30a   : > { %v1430_v12 = vadd.f32 1e-06, %v1424_v10 }
 0x30c   : > { %2586 = vrcp.f32 %v1430_v12 }
 0x30d   : > { %v1427_v13 = vpop.xlane.xlu1 %1426 }
 0x30e   : > { %v2583_v14 = vpop.eup %2582  ;;  %v1431_v15 = vadd.f32 1e-06, %v1427_v13 }
 0x30f   : > { %v1436_v16 = vmul.f32 %v2583_v14, %v2575_v60 }
 0x310   : > { %2588 = vrcp.f32 %v1431_v15 }
 0x311   : > { %2403 = vmatmul.mubr.msk.f32.vlgmr.msra.gmra.mrb[16].mxu0 %vm1391_vm3, %v1436_v16 }
 0x312   : > { %v2585_v17 = vpop.eup %2584  ;;  %2411 = vmatpush3.msra.mxu0 %v2982_v33  ;;  %2412 = vmatprep.mubr.msk.f32.mxu0 %vm2655_vm0, %v2656_v11  ;;  %v1739_v33 = vld [vmem:[%s3101_s2 + $0x38] sm:$0xff] }
 0x313   : > { %v1437_v19 = vmul.f32 %v2585_v17, %v2577_v63  ;;  %2520 = vmatprep.subr.bf16.mxu0 %v2654_v3 }
 0x315   : > { %2408 = vmatmul.mubr.msk.f32.vlgmr.msra.gmra.mrb[16].mxu1 %vm1391_vm3, %v1437_v19 }
 0x316   : > { %v2587_v22 = vpop.eup %2586  ;;  %2416 = vmatpush3.msra.mxu1 %v2984_v34  ;;  %2417 = vmatprep.mubr.msk.f32.mxu1 %vm2655_vm0, %v2656_v11 }
 0x317   : > { %v1438_v24 = vmul.f32 %v2587_v22, %v2579_v1  ;;  %2523 = vmatprep.subr.bf16.mxu1 %v2654_v3 }
 0x319   : > { %2413 = vmatmul.mubr.msk.f32.vlgmr.msra.gmra.mrb[18].mxu0 %vm1391_vm3, %v1438_v24 }
 0x31a   : > { %v2589_v18 = vpop.eup %2588  ;;  %2522 = vmatpush3.bf16.msra.mxu0 %v2521_v23  ;;  %2424 = vmatprep.mubr.msk.f32.mxu0 %vm2655_vm0, %v2656_v11 }
 0x31b   : > { %v1439_v25 = vmul.f32 %v2589_v18, %v2581_v4  ;;  %2526 = vmatprep.subr.bf16.mxu0 %v2654_v3 }
 0x31d   : > { %2418 = vmatmul.mubr.msk.f32.vlgmr.msra.gmra.mrb[18].mxu1 %vm1391_vm3, %v1439_v25 }
 0x31e   : > { %2431 = vmatprep.mubr.msk.f32.mxu1 %vm2655_vm0, %v2656_v11  ;;  %2525 = vmatpush3.bf16.msra.mxu1 %v2524_v28 }
 0x31f   : > { %2529 = vmatprep.subr.bf16.mxu1 %v2654_v3  ;;  %v2530_v3 = vpack.c.bf16 %v1739_v33, %v1738_v32 }
 0x3e4   : > { %v1509_v34 = vpop.f32.mrb[16].mxu0 }
 0x3e5   : > { %v2404_v35 = vpop.f32.mrb[17].mxu0  ;;  %2425 = vmatmul.mubr.msk.f32.vlgmr.msra.gmra.mrb[20].mxu0 %vm1086_vm2, %v1509_v34 }
 0x3e6   : > { %2528 = vmatpush3.bf16.msra.mxu0 %v2527_v31  ;;  %2438 = vmatprep.mubr.msk.f32.mxu0 %vm2655_vm0, %v2656_v11 }
 0x3e8   : > { %v1582_v36 = vpop.f32.mrb[16].mxu1 }
 0x3e9   : > { %v2409_v37 = vpop.f32.mrb[17].mxu1  ;;  %2432 = vmatmul.mubr.msk.f32.vlgmr.msra.gmra.mrb[20].mxu1 %vm1086_vm2, %v1582_v36 }
 0x3ea   : > { %2531 = vmatpush3.bf16.msra.mxu1 %v2530_v3  ;;  %2445 = vmatprep.mubr.msk.f32.mxu1 %vm2655_vm0, %v2656_v11 }
 0x3ec   : > { %v1655_v38 = vpop.f32.mrb[18].mxu0 }
 0x3ed   : > { %v2414_v39 = vpop.f32.mrb[19].mxu0  ;;  %2439 = vmatmul.mubr.msk.f32.vlgmr.msra.gmra.mrb[22].mxu0 %vm1086_vm2, %v1655_v38 }
 0x3f0   : > { %v1728_v40 = vpop.f32.mrb[18].mxu1 }
 0x3f1   : > { %v2419_v41 = vpop.f32.mrb[19].mxu1  ;;  %2446 = vmatmul.mubr.msk.f32.vlgmr.msra.gmra.mrb[22].mxu1 %vm1086_vm2, %v1728_v40 }
 0x4b8   : > { %v1809_v42 = vpop.f32.mrb[20].mxu0 }
 0x4b9   : > { %v2426_v43 = vpop.f32.mrb[21].mxu0  ;;  %v2032_v45 = vsel %vm242_vm1, %v1809_v42, 0.0 }
 0x4bc   : > { %v1882_v44 = vpop.f32.mrb[20].mxu1 }
 0x4bd   : > { %v2033_v46 = vsel %vm242_vm1, %v1882_v44, 0.0  ;;  %v2433_v47 = vpop.f32.mrb[21].mxu1 }
 0x4be   : > { %v2034_v48 = vadd.f32 %v2033_v46, %v2032_v45 }
 0x4c0   : > { %v1955_v11 = vpop.f32.mrb[22].mxu0 }
 0x4c1   : > { %v2035_v49 = vsel %vm242_vm1, %v1955_v11, 0.0  ;;  %v2440_v50 = vpop.f32.mrb[23].mxu0 }
 0x4c2   : > { %v2036_v51 = vadd.f32 %v2035_v49, %v2034_v48 }
 0x4c4   : > { %v2028_v52 = vpop.f32.mrb[22].mxu1 }
 0x4c5   : > { %v2037_v53 = vsel %vm242_vm1, %v2028_v52, 0.0  ;;  %v2447_v55 = vpop.f32.mrb[23].mxu1 }
 0x4c6   : > { %v2038_v56 = vadd.f32 %v2037_v53, %v2036_v51 }
 0x4c8   : > { %v2046_v57 = vadd.f32 %v2155_v54, %v2038_v56 }
 0x4ca   : > { %2047 = vst.msk [vmem:[%s188_s30] sm:$0xff] %vm242_vm1, %v2046_v57 }
 0x4cb   : > { %2603 = shalt.err (!%p2600_p3)
}
 0x4cc   : > { %s2604_s13 = scalar_lea.hbm %s3056_s8, 128  ;;  %s2608_s22 = scalar_lea.hbm %s3103_s4, 256 }
 0x4cd   : > { %p2605_p4 = scmp.ne.s32.totalorder %s3056_s8, %s2604_s13  ;;  %p2609_p9 = scmp.lt.u32.totalorder %s3056_s8, %s3103_s4 }
 0x4ce   : > { %p2610_p10 = scmp.lt.u32.totalorder %s2608_s22, %s2604_s13  ;;  %p2612_p12 = scmp.lt.u32.totalorder %s2604_s13, %s3056_s8 }
 0x4cf   : > { %p2606_p7 = pnand %p2605_p4, %p2721_p5 }
 0x4d0   : > { %p2611_p11 = por %p2610_p10, %p2609_p9 }
 0x4d1   : > { %p2607_p8 = pneg %p2606_p7 }
 0x4d2   : > { %p2613_p13 = por %p2612_p12, %p2611_p11 }
 0x4d4   : > { %p2614_p0 = pnand %p2613_p13, %p2607_p8 }
 0x4d6   : > { %2617 = shalt.err (!%p2614_p0)
}
 0x4d7   : > { %2532 = dma.vmem_to_hbm [thread:$0]  (%p2721_p5), %s3058_s5, 128, %s3056_s8, %s2049_s9  }
 0x4d8 PF: > { %p2538_p1 = scmp.ge.s32.totalorder %s2652_s18, 2  ;;  %s2074_s28 = sand.u32 1, %s2640_s15  }
 0x4d9   : > { %s2075_s29 = scalar_lea.sflag [#allocation3], %s2074_s28 }
 0x4da   : > { %p2535_p2 = pnand %p2538_p1, %p2725_p6 }
 0x4dc   : > { %2635 = dma.done.wait (!%p2535_p2), %s2075_s29, 128  }
 0x4dd   : > { %2637 = vsyncadd (!%p2535_p2), %s2075_s29, 4294967168  ;;  %p14_p3 = scmp.ge.s32.totalorder %s2708_s21, 4   ;;  %s3106_s15 = smov %s2644_s16 }
 0x4de   : > { %s3107_s16 = smov %s2648_s17  ;;  %s3108_s17 = smov %s2719_s24 }
 0x4df   : > { %s3109_s18 = smov %s2708_s21  ;;  %16 = sbr.rel (!%p14_p3) target bundleno = 3 (0x3), region = 71 }
 0x4e6   :  { %2080 = vsyncpa [#allocation3], 1 }
 0x4e7   :  { %2082 = vsyncpa [#allocation3 + $0x1], 1 }

</bundles_post_ra>
